<compile_context>
chip_gen: v5e
topology: v5e:2x2
jax: 0.10.0
libtpu: 0.0.40
codegen_flags: <defaults>
</compile_context>

<pallas_src>
import jax
import jax.numpy as jnp
from jax import lax
from jax.experimental import pallas as pl
from jax.experimental.pallas import tpu as pltpu

HIDDEN_SIZE = 32        # hidden_size
OUTPUT_SIZE = 64        # output_size (vocab)
LANES = 128             # lane-dense width (4 gate groups of H=32 lanes)
HID_LO, HID_HI = 2 * HIDDEN_SIZE, 3 * HIDDEN_SIZE   # hidden lives in lanes 64:96
NEG_INF = -1e30         # pad bias -> exp underflows to exactly 0 (keep f32!)

assert 4 * HIDDEN_SIZE == LANES and OUTPUT_SIZE <= LANES


def fused_decoder_kernel(xs_ref, h0_ref, w_i_ref, b_i_ref, w_h_ref, b_h_ref,
                         w_out_ref, b_out_ref, logp_ref, h_out_ref,
                         gi_ref, hs_ref):
    """T decoder steps with weights VMEM-resident and h carried in vregs."""
    T = xs_ref.shape[0]

    # --- 1) Batched input-side gate pre-activations (one MXU op, off the
    #        recurrent chain): (T, H) @ (H, 128) -> (T, 128) scratch.
    gi_ref[...] = (jnp.dot(xs_ref[...], w_i_ref[...],
                           preferred_element_type=jnp.float32)
                   + b_i_ref[...])

    # Small hoists only (~3 vregs): h-side bias and the lane-group mask.
    b_h = b_h_ref[...]                                          # (1, 128)
    lane = lax.broadcasted_iota(jnp.int32, (1, LANES), 1)
    grp_d = lane >= 3 * HIDDEN_SIZE                             # lanes 96:128

    # --- 2) Recurrence: one MXU push + one sigmoid + one tanh per step.
    def step(t, h):
        g_i = gi_ref[pl.ds(t, 1), :]                            # (1, 128)
        g_h = jnp.dot(h, w_h_ref[...],
                      preferred_element_type=jnp.float32) + b_h # (1, 128)
        rz = jax.nn.sigmoid(g_i + g_h)                          # r@[0:32], z@[32:64]
        rz64 = pltpu.roll(rz, shift=64, axis=1)                 # r@[64:96], z@[96:128]
        # n-gate (valid in lanes 64:96): i_n + b_in + r * (h_n + b_hn)
        n = jnp.tanh(g_i + rz64 * g_h)
        # Direction-proof 32-lane crossing for z: z is present at [32:64] (rz)
        # and [96:128] (rz64); after a 32-lane roll of the merged vector,
        # lanes [64:96] hold z regardless of the roll sign convention.
        z_dup = jnp.where(grp_d, rz64, rz)
        z_c = pltpu.roll(z_dup, shift=32, axis=1)               # z@[64:96]
        h_new = (1.0 - z_c) * n + z_c * h                       # valid @[64:96]
        hs_ref[pl.ds(t, 1), :] = h_new
        return h_new

    unroll = T if T <= 8 else 8
    h_final = lax.fori_loop(0, T, step, h0_ref[...], unroll=unroll)
    h_out_ref[...] = h_final                                    # lane-dense (1,128)

    # --- 3) Deferred output Linear + batched log-softmax over all T rows.
    #        Padded lanes get a -1e30 bias so they vanish from the softmax.
    logits = (jnp.dot(hs_ref[...], w_out_ref[...],
                      preferred_element_type=jnp.float32)
              + b_out_ref[...])                                 # (T, 128)
    m = jnp.max(logits, axis=-1, keepdims=True)
    lse = jnp.log(jnp.sum(jnp.exp(logits - m), axis=-1, keepdims=True)) + m
    logp_ref[...] = logits - lse                                # dense (T,128) store


def _pallas_decode(tokens, h0, params):
    """tokens: (T,) int32, h0: (1, H) f32 -> (log_probs (T, V), h (1, H))."""
    T = tokens.shape[0]
    # Pre-gather + ReLU of the embeddings in the wrapper (embarrassingly
    # parallel; keeps the data-dependent gather off the recurrent chain).
    xs = jnp.maximum(jnp.take(params["embedding"], tokens, axis=0), 0.0)
    h0_pad = jnp.zeros((1, LANES), jnp.float32).at[:, HID_LO:HID_HI].set(h0)

    vmem = pl.BlockSpec(memory_space=pltpu.MemorySpace.VMEM)
    logp_pad, h_pad = pl.pallas_call(
        fused_decoder_kernel,
        out_shape=(jax.ShapeDtypeStruct((T, LANES), jnp.float32),
                   jax.ShapeDtypeStruct((1, LANES), jnp.float32)),
        in_specs=[vmem] * 8,
        out_specs=(vmem, vmem),
        scratch_shapes=[pltpu.VMEM((T, LANES), jnp.float32),   # g_i per step
                        pltpu.VMEM((T, LANES), jnp.float32)],  # h_t per step
    )(xs, h0_pad,
      params["w_i_pad"], params["b_i_pad"],
      params["w_h_pad"], params["b_h_pad"],
      params["w_out_pad"], params["b_out_pad"])
    return logp_pad[:, :OUTPUT_SIZE], h_pad[:, HID_LO:HID_HI]


@jax.jit
def decoder_forward(token, hidden, params):
    """Single step matching PyTorch forward(input, hidden).
    token: (1, 1) int32; hidden: (1, 1, H) f32.
    NOTE: for token-by-token decoding prefer decoder_forward_seq (per-call
    launch + weight DMA dominates this path)."""
    logp, h = _pallas_decode(token.reshape((1,)),
                             hidden.reshape(1, HIDDEN_SIZE), params)
    return logp, h.reshape(1, 1, HIDDEN_SIZE)


@jax.jit
def decoder_forward_seq(tokens, hidden, params):
    """Fused T-step decode: one pallas_call for the whole token sequence.
    tokens: (T,) int32; hidden: (1, 1, H) f32."""
    logp, h = _pallas_decode(tokens, hidden.reshape(1, HIDDEN_SIZE), params)
    return logp, h.reshape(1, 1, HIDDEN_SIZE)


def make_params(key, hidden_size=HIDDEN_SIZE, output_size=OUTPUT_SIZE):
    """PyTorch-layout params + lane-packed kernel layout."""
    H, V = hidden_size, output_size
    assert H == HIDDEN_SIZE and V == OUTPUT_SIZE
    ks = jax.random.split(key, 7)
    s = 1.0 / (H ** 0.5)
    emb = jax.random.normal(ks[0], (V, H), jnp.float32)                 # nn.Embedding.weight
    w_ih = jax.random.uniform(ks[1], (3 * H, H), jnp.float32, -s, s)    # gru.weight_ih_l0
    w_hh = jax.random.uniform(ks[2], (3 * H, H), jnp.float32, -s, s)    # gru.weight_hh_l0
    b_ih = jax.random.uniform(ks[3], (3 * H,), jnp.float32, -s, s)      # gru.bias_ih_l0
    b_hh = jax.random.uniform(ks[4], (3 * H,), jnp.float32, -s, s)      # gru.bias_hh_l0
    w_out = jax.random.uniform(ks[5], (V, H), jnp.float32, -s, s)       # out.weight
    b_out = jax.random.uniform(ks[6], (V,), jnp.float32, -s, s)         # out.bias

    def gate_t(w, i):  # gate i of a PyTorch (3H, H) weight, transposed to (H, H)
        return jnp.transpose(w[i * H:(i + 1) * H, :])

    # Input-side packed weight: columns [r | z | n | 0].
    w_i = jnp.zeros((H, LANES), jnp.float32)
    w_i = (w_i.at[:, 0:H].set(gate_t(w_ih, 0))
              .at[:, H:2 * H].set(gate_t(w_ih, 1))
              .at[:, 2 * H:3 * H].set(gate_t(w_ih, 2)))
    b_i = jnp.zeros((1, LANES), jnp.float32)
    b_i = (b_i.at[0, 0:H].set(b_ih[0:H] + b_hh[0:H])            # r: b_ir + b_hr
              .at[0, H:2 * H].set(b_ih[H:2 * H] + b_hh[H:2 * H])  # z: b_iz + b_hz
              .at[0, 2 * H:3 * H].set(b_ih[2 * H:3 * H]))       # n: b_in only

    # Hidden-side packed weight: rows = hidden lanes [64:96], cols [r | z | n | 0].
    w_h = jnp.zeros((LANES, LANES), jnp.float32)
    w_h = (w_h.at[HID_LO:HID_HI, 0:H].set(gate_t(w_hh, 0))
              .at[HID_LO:HID_HI, H:2 * H].set(gate_t(w_hh, 1))
              .at[HID_LO:HID_HI, 2 * H:3 * H].set(gate_t(w_hh, 2)))
    b_h = jnp.zeros((1, LANES), jnp.float32).at[0, 2 * H:3 * H].set(b_hh[2 * H:3 * H])

    # Output Linear: rows = hidden lanes, V padded to 128 lanes (-1e30 bias).
    w_o = jnp.zeros((LANES, LANES), jnp.float32).at[HID_LO:HID_HI, 0:V].set(w_out.T)
    b_o = jnp.full((1, LANES), NEG_INF, jnp.float32).at[0, 0:V].set(b_out)

    return {
        # raw torch-layout params (used by the pure-JAX reference)
        "embedding": emb, "w_ih": w_ih, "w_hh": w_hh, "b_ih": b_ih, "b_hh": b_hh,
        "w_out": w_out, "b_out": b_out,
        # lane-packed kernel params
        "w_i_pad": w_i, "b_i_pad": b_i, "w_h_pad": w_h, "b_h_pad": b_h,
        "w_out_pad": w_o, "b_out_pad": b_o,
    }


def ref_forward_seq(tokens, hidden, params):
    """Pure-JAX reference implementing the PyTorch module directly."""
    H, V = HIDDEN_SIZE, OUTPUT_SIZE
    emb, w_ih, w_hh = params["embedding"], params["w_ih"], params["w_hh"]
    b_ih, b_hh = params["b_ih"], params["b_hh"]
    w_out, b_out = params["w_out"], params["b_out"]
    h = hidden.reshape(1, H)
    outs = []
    for t in range(tokens.shape[0]):
        x = jnp.maximum(emb[tokens[t]][None, :], 0.0)
        gi = x @ w_ih.T + b_ih                                   # (1, 3H)
        gh = h @ w_hh.T + b_hh                                   # (1, 3H)
        r = jax.nn.sigmoid(gi[:, 0:H] + gh[:, 0:H])
        z = jax.nn.sigmoid(gi[:, H:2 * H] + gh[:, H:2 * H])
        n = jnp.tanh(gi[:, 2 * H:3 * H] + r * gh[:, 2 * H:3 * H])
        h = (1.0 - z) * n + z * h
        logits = h @ w_out.T + b_out
        m = jnp.max(logits, axis=-1, keepdims=True)
        lse = jnp.log(jnp.sum(jnp.exp(logits - m), axis=-1, keepdims=True)) + m
        outs.append(logits - lse)
    return jnp.concatenate(outs, axis=0), h.reshape(1, 1, H)


if __name__ == "__main__":
    key = jax.random.PRNGKey(0)
    params = make_params(key)

    T = 8
    tokens = jax.random.randint(jax.random.PRNGKey(1), (T,), 0, OUTPUT_SIZE,
                                dtype=jnp.int32)
    hidden0 = jnp.zeros((1, 1, HIDDEN_SIZE), dtype=jnp.float32)   # initHidden()

    # Fused multi-step decode: one pallas_call for all T steps.
    logp_seq, h_final = decoder_forward_seq(tokens, hidden0, params)
    jax.block_until_ready((logp_seq, h_final))

    # Single-step form matching the PyTorch forward(input, hidden) signature.
    token = tokens[:1].reshape(1, 1)
    logp1, h1 = decoder_forward(token, hidden0, params)
    jax.block_until_ready((logp1, h1))

    # Correctness vs pure-JAX reference.
    ref_logp, ref_h = ref_forward_seq(tokens, hidden0, params)
    assert logp_seq.shape == (T, OUTPUT_SIZE)
    assert h_final.shape == (1, 1, HIDDEN_SIZE)
    assert logp1.shape == (1, OUTPUT_SIZE)
    assert h1.shape == (1, 1, HIDDEN_SIZE)
    assert jnp.allclose(logp_seq, ref_logp, atol=1e-4, rtol=1e-4)
    assert jnp.allclose(h_final, ref_h, atol=1e-4, rtol=1e-4)
    assert jnp.allclose(logp1, ref_logp[:1], atol=1e-4, rtol=1e-4)
    # log-softmax rows exponentiate to ~1
    rowsums = jnp.exp(logp_seq).sum(axis=-1)
    assert bool(jnp.all(jnp.abs(rowsums - 1.0) < 1e-4))

    print("KERNEL_OK")
</pallas_src>

<mosaic_0001>
module attributes {stable_mosaic.version = 11 : i64} {
  func.func @fused_decoder_kernel(%arg0: memref<8x32xf32, #tpu.memory_space<vmem>>, %arg1: memref<1x128xf32, #tpu.memory_space<vmem>>, %arg2: memref<32x128xf32, #tpu.memory_space<vmem>>, %arg3: memref<1x128xf32, #tpu.memory_space<vmem>>, %arg4: memref<128x128xf32, #tpu.memory_space<vmem>>, %arg5: memref<1x128xf32, #tpu.memory_space<vmem>>, %arg6: memref<128x128xf32, #tpu.memory_space<vmem>>, %arg7: memref<1x128xf32, #tpu.memory_space<vmem>>, %arg8: memref<8x128xf32, #tpu.memory_space<vmem>>, %arg9: memref<1x128xf32, #tpu.memory_space<vmem>>, %arg10: memref<8x128xf32, #tpu.memory_space<vmem>>, %arg11: memref<8x128xf32, #tpu.memory_space<vmem>>) attributes {dimension_semantics = [], scalar_prefetch = 0 : i64, scratch_operands = 2 : i64, tpu.core_type = #tpu.core_type<tc>} {
    %c0 = arith.constant 0 : index
    %c0_0 = arith.constant 0 : index
    %0 = vector.load %arg0[%c0, %c0_0] : memref<8x32xf32, #tpu.memory_space<vmem>>, vector<8x32xf32>
    %c0_1 = arith.constant 0 : index
    %c0_2 = arith.constant 0 : index
    %1 = vector.load %arg2[%c0_1, %c0_2] : memref<32x128xf32, #tpu.memory_space<vmem>>, vector<32x128xf32>
    %cst = arith.constant dense<0.000000e+00> : vector<8x128xf32>
    %2 = tpu.matmul %0, %1, %cst {dimension_numbers = #tpu.dot_dimension_numbers<[1], [0], [0], [1], [0, 0, 1, 1], [], []>} : vector<8x32xf32>, vector<32x128xf32>, vector<8x128xf32> -> vector<8x128xf32>
    %c0_3 = arith.constant 0 : index
    %c0_4 = arith.constant 0 : index
    %3 = vector.load %arg3[%c0_3, %c0_4] : memref<1x128xf32, #tpu.memory_space<vmem>>, vector<1x128xf32>
    %4 = vector.broadcast %3 : vector<1x128xf32> to vector<8x128xf32>
    %5 = arith.addf %2, %4 : vector<8x128xf32>
    %c0_5 = arith.constant 0 : index
    %c0_6 = arith.constant 0 : index
    %6 = vector.load %arg10[%c0_5, %c0_6] : memref<8x128xf32, #tpu.memory_space<vmem>>, vector<8x128xf32>
    tpu.vector_store %arg10[%c0_5, %c0_6], %5 {strides = array<i32>} : memref<8x128xf32, #tpu.memory_space<vmem>>, vector<8x128xf32>,
    %c0_7 = arith.constant 0 : index
    %c0_8 = arith.constant 0 : index
    %7 = vector.load %arg5[%c0_7, %c0_8] : memref<1x128xf32, #tpu.memory_space<vmem>>, vector<1x128xf32>
    %8 = tpu.iota {dimensions = array<i32: 1>} : vector<1x128xi32>
    %c96_i32 = arith.constant 96 : i32
    %9 = vector.broadcast %c96_i32 : i32 to vector<1x128xi32>
    %10 = arith.cmpi sge, %8, %9 : vector<1x128xi32>
    %c0_9 = arith.constant 0 : index
    %c0_10 = arith.constant 0 : index
    %11 = vector.load %arg1[%c0_9, %c0_10] : memref<1x128xf32, #tpu.memory_space<vmem>>, vector<1x128xf32>
    %c0_i32 = arith.constant 0 : i32
    %12 = arith.index_cast %c0_i32 : i32 to index
    %c0_11 = arith.constant 0 : index
    %13 = vector.load %arg10[%12, %c0_11] : memref<8x128xf32, #tpu.memory_space<vmem>>, vector<1x128xf32>
    %c0_12 = arith.constant 0 : index
    %c0_13 = arith.constant 0 : index
    %14 = vector.load %arg4[%c0_12, %c0_13] : memref<128x128xf32, #tpu.memory_space<vmem>>, vector<128x128xf32>
    %cst_14 = arith.constant dense<0.000000e+00> : vector<1x128xf32>
    %15 = tpu.matmul %11, %14, %cst_14 {dimension_numbers = #tpu.dot_dimension_numbers<[1], [0], [0], [1], [0, 0, 1, 1], [], []>} : vector<1x128xf32>, vector<128x128xf32>, vector<1x128xf32> -> vector<1x128xf32>
    %16 = arith.addf %15, %7 : vector<1x128xf32>
    %17 = arith.addf %13, %16 : vector<1x128xf32>
    %18 = arith.negf %17 : vector<1x128xf32>
    %19 = math.exp %18 : vector<1x128xf32>
    %cst_15 = arith.constant 1.000000e+00 : f32
    %20 = vector.broadcast %cst_15 : f32 to vector<1x128xf32>
    %21 = arith.addf %20, %19 : vector<1x128xf32>
    %22 = arith.divf %20, %21 : vector<1x128xf32>
    %c64_i32 = arith.constant 64 : i32
    %23 = tpu.dynamic_rotate %22 by %c64_i32 dim 1 : vector<1x128xf32>, i32 -> vector<1x128xf32>
    %24 = arith.mulf %23, %16 : vector<1x128xf32>
    %25 = arith.addf %13, %24 : vector<1x128xf32>
    %26 = math.tanh %25 : vector<1x128xf32>
    %27 = arith.select %10, %23, %22 : vector<1x128xi1>, vector<1x128xf32>
    %c32_i32 = arith.constant 32 : i32
    %28 = tpu.dynamic_rotate %27 by %c32_i32 dim 1 : vector<1x128xf32>, i32 -> vector<1x128xf32>
    %cst_16 = arith.constant 1.000000e+00 : f32
    %29 = vector.broadcast %cst_16 : f32 to vector<1x128xf32>
    %30 = arith.subf %29, %28 : vector<1x128xf32>
    %31 = arith.mulf %30, %26 : vector<1x128xf32>
    %32 = arith.mulf %28, %11 : vector<1x128xf32>
    %33 = arith.addf %31, %32 : vector<1x128xf32>
    %34 = arith.index_cast %c0_i32 : i32 to index
    %c0_17 = arith.constant 0 : index
    %35 = vector.load %arg11[%34, %c0_17] : memref<8x128xf32, #tpu.memory_space<vmem>>, vector<1x128xf32>
    tpu.vector_store %arg11[%34, %c0_17], %33 {strides = array<i32>} : memref<8x128xf32, #tpu.memory_space<vmem>>, vector<1x128xf32>,
    %c1_i32 = arith.constant 1 : i32
    %36 = arith.index_cast %c1_i32 : i32 to index
    %c0_18 = arith.constant 0 : index
    %37 = vector.load %arg10[%36, %c0_18] : memref<8x128xf32, #tpu.memory_space<vmem>>, vector<1x128xf32>
    %c0_19 = arith.constant 0 : index
    %c0_20 = arith.constant 0 : index
    %38 = vector.load %arg4[%c0_19, %c0_20] : memref<128x128xf32, #tpu.memory_space<vmem>>, vector<128x128xf32>
    %cst_21 = arith.constant dense<0.000000e+00> : vector<1x128xf32>
    %39 = tpu.matmul %33, %38, %cst_21 {dimension_numbers = #tpu.dot_dimension_numbers<[1], [0], [0], [1], [0, 0, 1, 1], [], []>} : vector<1x128xf32>, vector<128x128xf32>, vector<1x128xf32> -> vector<1x128xf32>
    %40 = arith.addf %39, %7 : vector<1x128xf32>
    %41 = arith.addf %37, %40 : vector<1x128xf32>
    %42 = arith.negf %41 : vector<1x128xf32>
    %43 = math.exp %42 : vector<1x128xf32>
    %cst_22 = arith.constant 1.000000e+00 : f32
    %44 = vector.broadcast %cst_22 : f32 to vector<1x128xf32>
    %45 = arith.addf %44, %43 : vector<1x128xf32>
    %46 = arith.divf %44, %45 : vector<1x128xf32>
    %c64_i32_23 = arith.constant 64 : i32
    %47 = tpu.dynamic_rotate %46 by %c64_i32_23 dim 1 : vector<1x128xf32>, i32 -> vector<1x128xf32>
    %48 = arith.mulf %47, %40 : vector<1x128xf32>
    %49 = arith.addf %37, %48 : vector<1x128xf32>
    %50 = math.tanh %49 : vector<1x128xf32>
    %51 = arith.select %10, %47, %46 : vector<1x128xi1>, vector<1x128xf32>
    %c32_i32_24 = arith.constant 32 : i32
    %52 = tpu.dynamic_rotate %51 by %c32_i32_24 dim 1 : vector<1x128xf32>, i32 -> vector<1x128xf32>
    %cst_25 = arith.constant 1.000000e+00 : f32
    %53 = vector.broadcast %cst_25 : f32 to vector<1x128xf32>
    %54 = arith.subf %53, %52 : vector<1x128xf32>
    %55 = arith.mulf %54, %50 : vector<1x128xf32>
    %56 = arith.mulf %52, %33 : vector<1x128xf32>
    %57 = arith.addf %55, %56 : vector<1x128xf32>
    %58 = arith.index_cast %c1_i32 : i32 to index
    %c0_26 = arith.constant 0 : index
    %59 = vector.load %arg11[%58, %c0_26] : memref<8x128xf32, #tpu.memory_space<vmem>>, vector<1x128xf32>
    tpu.vector_store %arg11[%58, %c0_26], %57 {strides = array<i32>} : memref<8x128xf32, #tpu.memory_space<vmem>>, vector<1x128xf32>,
    %c2_i32 = arith.constant 2 : i32
    %60 = arith.index_cast %c2_i32 : i32 to index
    %c0_27 = arith.constant 0 : index
    %61 = vector.load %arg10[%60, %c0_27] : memref<8x128xf32, #tpu.memory_space<vmem>>, vector<1x128xf32>
    %c0_28 = arith.constant 0 : index
    %c0_29 = arith.constant 0 : index
    %62 = vector.load %arg4[%c0_28, %c0_29] : memref<128x128xf32, #tpu.memory_space<vmem>>, vector<128x128xf32>
    %cst_30 = arith.constant dense<0.000000e+00> : vector<1x128xf32>
    %63 = tpu.matmul %57, %62, %cst_30 {dimension_numbers = #tpu.dot_dimension_numbers<[1], [0], [0], [1], [0, 0, 1, 1], [], []>} : vector<1x128xf32>, vector<128x128xf32>, vector<1x128xf32> -> vector<1x128xf32>
    %64 = arith.addf %63, %7 : vector<1x128xf32>
    %65 = arith.addf %61, %64 : vector<1x128xf32>
    %66 = arith.negf %65 : vector<1x128xf32>
    %67 = math.exp %66 : vector<1x128xf32>
    %cst_31 = arith.constant 1.000000e+00 : f32
    %68 = vector.broadcast %cst_31 : f32 to vector<1x128xf32>
    %69 = arith.addf %68, %67 : vector<1x128xf32>
    %70 = arith.divf %68, %69 : vector<1x128xf32>
    %c64_i32_32 = arith.constant 64 : i32
    %71 = tpu.dynamic_rotate %70 by %c64_i32_32 dim 1 : vector<1x128xf32>, i32 -> vector<1x128xf32>
    %72 = arith.mulf %71, %64 : vector<1x128xf32>
    %73 = arith.addf %61, %72 : vector<1x128xf32>
    %74 = math.tanh %73 : vector<1x128xf32>
    %75 = arith.select %10, %71, %70 : vector<1x128xi1>, vector<1x128xf32>
    %c32_i32_33 = arith.constant 32 : i32
    %76 = tpu.dynamic_rotate %75 by %c32_i32_33 dim 1 : vector<1x128xf32>, i32 -> vector<1x128xf32>
    %cst_34 = arith.constant 1.000000e+00 : f32
    %77 = vector.broadcast %cst_34 : f32 to vector<1x128xf32>
    %78 = arith.subf %77, %76 : vector<1x128xf32>
    %79 = arith.mulf %78, %74 : vector<1x128xf32>
    %80 = arith.mulf %76, %57 : vector<1x128xf32>
    %81 = arith.addf %79, %80 : vector<1x128xf32>
    %82 = arith.index_cast %c2_i32 : i32 to index
    %c0_35 = arith.constant 0 : index
    %83 = vector.load %arg11[%82, %c0_35] : memref<8x128xf32, #tpu.memory_space<vmem>>, vector<1x128xf32>
    tpu.vector_store %arg11[%82, %c0_35], %81 {strides = array<i32>} : memref<8x128xf32, #tpu.memory_space<vmem>>, vector<1x128xf32>,
    %c3_i32 = arith.constant 3 : i32
    %84 = arith.index_cast %c3_i32 : i32 to index
    %c0_36 = arith.constant 0 : index
    %85 = vector.load %arg10[%84, %c0_36] : memref<8x128xf32, #tpu.memory_space<vmem>>, vector<1x128xf32>
    %c0_37 = arith.constant 0 : index
    %c0_38 = arith.constant 0 : index
    %86 = vector.load %arg4[%c0_37, %c0_38] : memref<128x128xf32, #tpu.memory_space<vmem>>, vector<128x128xf32>
    %cst_39 = arith.constant dense<0.000000e+00> : vector<1x128xf32>
    %87 = tpu.matmul %81, %86, %cst_39 {dimension_numbers = #tpu.dot_dimension_numbers<[1], [0], [0], [1], [0, 0, 1, 1], [], []>} : vector<1x128xf32>, vector<128x128xf32>, vector<1x128xf32> -> vector<1x128xf32>
    %88 = arith.addf %87, %7 : vector<1x128xf32>
    %89 = arith.addf %85, %88 : vector<1x128xf32>
    %90 = arith.negf %89 : vector<1x128xf32>
    %91 = math.exp %90 : vector<1x128xf32>
    %cst_40 = arith.constant 1.000000e+00 : f32
    %92 = vector.broadcast %cst_40 : f32 to vector<1x128xf32>
    %93 = arith.addf %92, %91 : vector<1x128xf32>
    %94 = arith.divf %92, %93 : vector<1x128xf32>
    %c64_i32_41 = arith.constant 64 : i32
    %95 = tpu.dynamic_rotate %94 by %c64_i32_41 dim 1 : vector<1x128xf32>, i32 -> vector<1x128xf32>
    %96 = arith.mulf %95, %88 : vector<1x128xf32>
    %97 = arith.addf %85, %96 : vector<1x128xf32>
    %98 = math.tanh %97 : vector<1x128xf32>
    %99 = arith.select %10, %95, %94 : vector<1x128xi1>, vector<1x128xf32>
    %c32_i32_42 = arith.constant 32 : i32
    %100 = tpu.dynamic_rotate %99 by %c32_i32_42 dim 1 : vector<1x128xf32>, i32 -> vector<1x128xf32>
    %cst_43 = arith.constant 1.000000e+00 : f32
    %101 = vector.broadcast %cst_43 : f32 to vector<1x128xf32>
    %102 = arith.subf %101, %100 : vector<1x128xf32>
    %103 = arith.mulf %102, %98 : vector<1x128xf32>
    %104 = arith.mulf %100, %81 : vector<1x128xf32>
    %105 = arith.addf %103, %104 : vector<1x128xf32>
    %106 = arith.index_cast %c3_i32 : i32 to index
    %c0_44 = arith.constant 0 : index
    %107 = vector.load %arg11[%106, %c0_44] : memref<8x128xf32, #tpu.memory_space<vmem>>, vector<1x128xf32>
    tpu.vector_store %arg11[%106, %c0_44], %105 {strides = array<i32>} : memref<8x128xf32, #tpu.memory_space<vmem>>, vector<1x128xf32>,
    %c4_i32 = arith.constant 4 : i32
    %108 = arith.index_cast %c4_i32 : i32 to index
    %c0_45 = arith.constant 0 : index
    %109 = vector.load %arg10[%108, %c0_45] : memref<8x128xf32, #tpu.memory_space<vmem>>, vector<1x128xf32>
    %c0_46 = arith.constant 0 : index
    %c0_47 = arith.constant 0 : index
    %110 = vector.load %arg4[%c0_46, %c0_47] : memref<128x128xf32, #tpu.memory_space<vmem>>, vector<128x128xf32>
    %cst_48 = arith.constant dense<0.000000e+00> : vector<1x128xf32>
    %111 = tpu.matmul %105, %110, %cst_48 {dimension_numbers = #tpu.dot_dimension_numbers<[1], [0], [0], [1], [0, 0, 1, 1], [], []>} : vector<1x128xf32>, vector<128x128xf32>, vector<1x128xf32> -> vector<1x128xf32>
    %112 = arith.addf %111, %7 : vector<1x128xf32>
    %113 = arith.addf %109, %112 : vector<1x128xf32>
    %114 = arith.negf %113 : vector<1x128xf32>
    %115 = math.exp %114 : vector<1x128xf32>
    %cst_49 = arith.constant 1.000000e+00 : f32
    %116 = vector.broadcast %cst_49 : f32 to vector<1x128xf32>
    %117 = arith.addf %116, %115 : vector<1x128xf32>
    %118 = arith.divf %116, %117 : vector<1x128xf32>
    %c64_i32_50 = arith.constant 64 : i32
    %119 = tpu.dynamic_rotate %118 by %c64_i32_50 dim 1 : vector<1x128xf32>, i32 -> vector<1x128xf32>
    %120 = arith.mulf %119, %112 : vector<1x128xf32>
    %121 = arith.addf %109, %120 : vector<1x128xf32>
    %122 = math.tanh %121 : vector<1x128xf32>
    %123 = arith.select %10, %119, %118 : vector<1x128xi1>, vector<1x128xf32>
    %c32_i32_51 = arith.constant 32 : i32
    %124 = tpu.dynamic_rotate %123 by %c32_i32_51 dim 1 : vector<1x128xf32>, i32 -> vector<1x128xf32>
    %cst_52 = arith.constant 1.000000e+00 : f32
    %125 = vector.broadcast %cst_52 : f32 to vector<1x128xf32>
    %126 = arith.subf %125, %124 : vector<1x128xf32>
    %127 = arith.mulf %126, %122 : vector<1x128xf32>
    %128 = arith.mulf %124, %105 : vector<1x128xf32>
    %129 = arith.addf %127, %128 : vector<1x128xf32>
    %130 = arith.index_cast %c4_i32 : i32 to index
    %c0_53 = arith.constant 0 : index
    %131 = vector.load %arg11[%130, %c0_53] : memref<8x128xf32, #tpu.memory_space<vmem>>, vector<1x128xf32>
    tpu.vector_store %arg11[%130, %c0_53], %129 {strides = array<i32>} : memref<8x128xf32, #tpu.memory_space<vmem>>, vector<1x128xf32>,
    %c5_i32 = arith.constant 5 : i32
    %132 = arith.index_cast %c5_i32 : i32 to index
    %c0_54 = arith.constant 0 : index
    %133 = vector.load %arg10[%132, %c0_54] : memref<8x128xf32, #tpu.memory_space<vmem>>, vector<1x128xf32>
    %c0_55 = arith.constant 0 : index
    %c0_56 = arith.constant 0 : index
    %134 = vector.load %arg4[%c0_55, %c0_56] : memref<128x128xf32, #tpu.memory_space<vmem>>, vector<128x128xf32>
    %cst_57 = arith.constant dense<0.000000e+00> : vector<1x128xf32>
    %135 = tpu.matmul %129, %134, %cst_57 {dimension_numbers = #tpu.dot_dimension_numbers<[1], [0], [0], [1], [0, 0, 1, 1], [], []>} : vector<1x128xf32>, vector<128x128xf32>, vector<1x128xf32> -> vector<1x128xf32>
    %136 = arith.addf %135, %7 : vector<1x128xf32>
    %137 = arith.addf %133, %136 : vector<1x128xf32>
    %138 = arith.negf %137 : vector<1x128xf32>
    %139 = math.exp %138 : vector<1x128xf32>
    %cst_58 = arith.constant 1.000000e+00 : f32
    %140 = vector.broadcast %cst_58 : f32 to vector<1x128xf32>
    %141 = arith.addf %140, %139 : vector<1x128xf32>
    %142 = arith.divf %140, %141 : vector<1x128xf32>
    %c64_i32_59 = arith.constant 64 : i32
    %143 = tpu.dynamic_rotate %142 by %c64_i32_59 dim 1 : vector<1x128xf32>, i32 -> vector<1x128xf32>
    %144 = arith.mulf %143, %136 : vector<1x128xf32>
    %145 = arith.addf %133, %144 : vector<1x128xf32>
    %146 = math.tanh %145 : vector<1x128xf32>
    %147 = arith.select %10, %143, %142 : vector<1x128xi1>, vector<1x128xf32>
    %c32_i32_60 = arith.constant 32 : i32
    %148 = tpu.dynamic_rotate %147 by %c32_i32_60 dim 1 : vector<1x128xf32>, i32 -> vector<1x128xf32>
    %cst_61 = arith.constant 1.000000e+00 : f32
    %149 = vector.broadcast %cst_61 : f32 to vector<1x128xf32>
    %150 = arith.subf %149, %148 : vector<1x128xf32>
    %151 = arith.mulf %150, %146 : vector<1x128xf32>
    %152 = arith.mulf %148, %129 : vector<1x128xf32>
    %153 = arith.addf %151, %152 : vector<1x128xf32>
    %154 = arith.index_cast %c5_i32 : i32 to index
    %c0_62 = arith.constant 0 : index
    %155 = vector.load %arg11[%154, %c0_62] : memref<8x128xf32, #tpu.memory_space<vmem>>, vector<1x128xf32>
    tpu.vector_store %arg11[%154, %c0_62], %153 {strides = array<i32>} : memref<8x128xf32, #tpu.memory_space<vmem>>, vector<1x128xf32>,
    %c6_i32 = arith.constant 6 : i32
    %156 = arith.index_cast %c6_i32 : i32 to index
    %c0_63 = arith.constant 0 : index
    %157 = vector.load %arg10[%156, %c0_63] : memref<8x128xf32, #tpu.memory_space<vmem>>, vector<1x128xf32>
    %c0_64 = arith.constant 0 : index
    %c0_65 = arith.constant 0 : index
    %158 = vector.load %arg4[%c0_64, %c0_65] : memref<128x128xf32, #tpu.memory_space<vmem>>, vector<128x128xf32>
    %cst_66 = arith.constant dense<0.000000e+00> : vector<1x128xf32>
    %159 = tpu.matmul %153, %158, %cst_66 {dimension_numbers = #tpu.dot_dimension_numbers<[1], [0], [0], [1], [0, 0, 1, 1], [], []>} : vector<1x128xf32>, vector<128x128xf32>, vector<1x128xf32> -> vector<1x128xf32>
    %160 = arith.addf %159, %7 : vector<1x128xf32>
    %161 = arith.addf %157, %160 : vector<1x128xf32>
    %162 = arith.negf %161 : vector<1x128xf32>
    %163 = math.exp %162 : vector<1x128xf32>
    %cst_67 = arith.constant 1.000000e+00 : f32
    %164 = vector.broadcast %cst_67 : f32 to vector<1x128xf32>
    %165 = arith.addf %164, %163 : vector<1x128xf32>
    %166 = arith.divf %164, %165 : vector<1x128xf32>
    %c64_i32_68 = arith.constant 64 : i32
    %167 = tpu.dynamic_rotate %166 by %c64_i32_68 dim 1 : vector<1x128xf32>, i32 -> vector<1x128xf32>
    %168 = arith.mulf %167, %160 : vector<1x128xf32>
    %169 = arith.addf %157, %168 : vector<1x128xf32>
    %170 = math.tanh %169 : vector<1x128xf32>
    %171 = arith.select %10, %167, %166 : vector<1x128xi1>, vector<1x128xf32>
    %c32_i32_69 = arith.constant 32 : i32
    %172 = tpu.dynamic_rotate %171 by %c32_i32_69 dim 1 : vector<1x128xf32>, i32 -> vector<1x128xf32>
    %cst_70 = arith.constant 1.000000e+00 : f32
    %173 = vector.broadcast %cst_70 : f32 to vector<1x128xf32>
    %174 = arith.subf %173, %172 : vector<1x128xf32>
    %175 = arith.mulf %174, %170 : vector<1x128xf32>
    %176 = arith.mulf %172, %153 : vector<1x128xf32>
    %177 = arith.addf %175, %176 : vector<1x128xf32>
    %178 = arith.index_cast %c6_i32 : i32 to index
    %c0_71 = arith.constant 0 : index
    %179 = vector.load %arg11[%178, %c0_71] : memref<8x128xf32, #tpu.memory_space<vmem>>, vector<1x128xf32>
    tpu.vector_store %arg11[%178, %c0_71], %177 {strides = array<i32>} : memref<8x128xf32, #tpu.memory_space<vmem>>, vector<1x128xf32>,
    %c7_i32 = arith.constant 7 : i32
    %180 = arith.index_cast %c7_i32 : i32 to index
    %c0_72 = arith.constant 0 : index
    %181 = vector.load %arg10[%180, %c0_72] : memref<8x128xf32, #tpu.memory_space<vmem>>, vector<1x128xf32>
    %c0_73 = arith.constant 0 : index
    %c0_74 = arith.constant 0 : index
    %182 = vector.load %arg4[%c0_73, %c0_74] : memref<128x128xf32, #tpu.memory_space<vmem>>, vector<128x128xf32>
    %cst_75 = arith.constant dense<0.000000e+00> : vector<1x128xf32>
    %183 = tpu.matmul %177, %182, %cst_75 {dimension_numbers = #tpu.dot_dimension_numbers<[1], [0], [0], [1], [0, 0, 1, 1], [], []>} : vector<1x128xf32>, vector<128x128xf32>, vector<1x128xf32> -> vector<1x128xf32>
    %184 = arith.addf %183, %7 : vector<1x128xf32>
    %185 = arith.addf %181, %184 : vector<1x128xf32>
    %186 = arith.negf %185 : vector<1x128xf32>
    %187 = math.exp %186 : vector<1x128xf32>
    %cst_76 = arith.constant 1.000000e+00 : f32
    %188 = vector.broadcast %cst_76 : f32 to vector<1x128xf32>
    %189 = arith.addf %188, %187 : vector<1x128xf32>
    %190 = arith.divf %188, %189 : vector<1x128xf32>
    %c64_i32_77 = arith.constant 64 : i32
    %191 = tpu.dynamic_rotate %190 by %c64_i32_77 dim 1 : vector<1x128xf32>, i32 -> vector<1x128xf32>
    %192 = arith.mulf %191, %184 : vector<1x128xf32>
    %193 = arith.addf %181, %192 : vector<1x128xf32>
    %194 = math.tanh %193 : vector<1x128xf32>
    %195 = arith.select %10, %191, %190 : vector<1x128xi1>, vector<1x128xf32>
    %c32_i32_78 = arith.constant 32 : i32
    %196 = tpu.dynamic_rotate %195 by %c32_i32_78 dim 1 : vector<1x128xf32>, i32 -> vector<1x128xf32>
    %cst_79 = arith.constant 1.000000e+00 : f32
    %197 = vector.broadcast %cst_79 : f32 to vector<1x128xf32>
    %198 = arith.subf %197, %196 : vector<1x128xf32>
    %199 = arith.mulf %198, %194 : vector<1x128xf32>
    %200 = arith.mulf %196, %177 : vector<1x128xf32>
    %201 = arith.addf %199, %200 : vector<1x128xf32>
    %202 = arith.index_cast %c7_i32 : i32 to index
    %c0_80 = arith.constant 0 : index
    %203 = vector.load %arg11[%202, %c0_80] : memref<8x128xf32, #tpu.memory_space<vmem>>, vector<1x128xf32>
    tpu.vector_store %arg11[%202, %c0_80], %201 {strides = array<i32>} : memref<8x128xf32, #tpu.memory_space<vmem>>, vector<1x128xf32>,
    %c8_i32 = arith.constant 8 : i32
    %c0_81 = arith.constant 0 : index
    %c0_82 = arith.constant 0 : index
    %204 = vector.load %arg9[%c0_81, %c0_82] : memref<1x128xf32, #tpu.memory_space<vmem>>, vector<1x128xf32>
    tpu.vector_store %arg9[%c0_81, %c0_82], %201 {strides = array<i32>} : memref<1x128xf32, #tpu.memory_space<vmem>>, vector<1x128xf32>,
    %c0_83 = arith.constant 0 : index
    %c0_84 = arith.constant 0 : index
    %205 = vector.load %arg11[%c0_83, %c0_84] : memref<8x128xf32, #tpu.memory_space<vmem>>, vector<8x128xf32>
    %c0_85 = arith.constant 0 : index
    %c0_86 = arith.constant 0 : index
    %206 = vector.load %arg6[%c0_85, %c0_86] : memref<128x128xf32, #tpu.memory_space<vmem>>, vector<128x128xf32>
    %cst_87 = arith.constant dense<0.000000e+00> : vector<8x128xf32>
    %207 = tpu.matmul %205, %206, %cst_87 {dimension_numbers = #tpu.dot_dimension_numbers<[1], [0], [0], [1], [0, 0, 1, 1], [], []>} : vector<8x128xf32>, vector<128x128xf32>, vector<8x128xf32> -> vector<8x128xf32>
    %c0_88 = arith.constant 0 : index
    %c0_89 = arith.constant 0 : index
    %208 = vector.load %arg7[%c0_88, %c0_89] : memref<1x128xf32, #tpu.memory_space<vmem>>, vector<1x128xf32>
    %209 = vector.broadcast %208 : vector<1x128xf32> to vector<8x128xf32>
    %210 = arith.addf %207, %209 : vector<8x128xf32>
    %cst_90 = arith.constant dense<0xFF800000> : vector<8xf32>
    %211 = vector.multi_reduction <maximumf>, %210, %cst_90 [1] : vector<8x128xf32> to vector<8xf32>
    %212 = vector.shape_cast %211 : vector<8xf32> to vector<8x1xf32>
    %213 = vector.broadcast %212 : vector<8x1xf32> to vector<8x128xf32>
    %214 = arith.subf %210, %213 : vector<8x128xf32>
    %215 = math.exp %214 : vector<8x128xf32>
    %cst_91 = arith.constant dense<0.000000e+00> : vector<8xf32>
    %216 = vector.multi_reduction <add>, %215, %cst_91 [1] : vector<8x128xf32> to vector<8xf32>
    %217 = vector.shape_cast %216 : vector<8xf32> to vector<8x1xf32>
    %218 = math.log %217 : vector<8x1xf32>
    %219 = arith.addf %218, %212 : vector<8x1xf32>
    %220 = vector.broadcast %219 : vector<8x1xf32> to vector<8x128xf32>
    %221 = arith.subf %210, %220 : vector<8x128xf32>
    %c0_92 = arith.constant 0 : index
    %c0_93 = arith.constant 0 : index
    %222 = vector.load %arg8[%c0_92, %c0_93] : memref<8x128xf32, #tpu.memory_space<vmem>>, vector<8x128xf32>
    tpu.vector_store %arg8[%c0_92, %c0_93], %221 {strides = array<i32>} : memref<8x128xf32, #tpu.memory_space<vmem>>, vector<8x128xf32>,
    return
  }
}

</mosaic_0001>

<bundles_post_ra>
// kernel: decoder_forward_seq.1
= control target key start
LH: loop header
LB: loop body
LE: loop exit
PB: predicated region body
PF: predicated region fallthrough
CT: control target
= control target key end

     0   :  { %15 = vsyncpa [#allocation5], 0  ;;  %s1197_s0 = inlined_call_operand.vmem [shape: f32[8,32], index: 0, kind: input, shape index: {}]   ;;  %s1198_s1 = inlined_call_operand.vmem [shape: f32[1,128], index: 1, kind: input, shape index: {}]   ;;  %s1199_s2 = inlined_call_operand.vmem [shape: f32[32,128], index: 2, kind: input, shape index: {}]   ;;  %s1200_s3 = inlined_call_operand.vmem [shape: f32[1,128], index: 3, kind: input, shape index: {}]   ;;  %s1201_s4 = inlined_call_operand.vmem [shape: f32[128,128], index: 4, kind: input, shape index: {}]   ;;  %s1202_s5 = inlined_call_operand.vmem [shape: f32[1,128], index: 5, kind: input, shape index: {}]   ;;  %s1203_s6 = inlined_call_operand.hbm [shape: f32[128,128], index: 6, kind: input, shape index: {}]   ;;  %s1204_s7 = inlined_call_operand.vmem [shape: f32[1,128], index: 7, kind: input, shape index: {}]   ;;  %s1205_s8 = inlined_call_operand.hbm [shape: f32[8,128], index: 8, kind: output, shape index: {0}]   ;;  %s1206_s9 = inlined_call_operand.vmem [shape: f32[1,128], index: 9, kind: output, shape index: {1}]  }
   0x1   :  { %16 = vsyncpa [#allocation6], 0  ;;  %s33_s11 = sshll.u32 %s1203_s6, 4  ;;  %s843_s12 = smov [#allocation4]   ;;  %s34_s11 = int_to_ptr.hbm [resolvable:$true] %s33_s11 }
   0x2   :  { %s35_s13 = sshll.u32 %s843_s12, 4  ;;  %s844_s14 = smov 128   ;;  %s36_s13 = int_to_ptr.vmem [resolvable:$true] %s35_s13 }
   0x3   :  { %s845_s15 = smov 8  }
   0x4   :  { %41 = dma.hbm_to_vmem [thread:$0]  %s34_s11, 2048, %s36_s13, [#allocation5], %s844_s14, %s844_s14, %s845_s15  }
   0x5   :  { %839 = dma.done.wait [#allocation5], 2048  }
   0x6   :  { %840 = vsyncadd [#allocation5], 4294965248  ;;  %v905_v0 = vld [vmem:[%s1201_s4 + $0x78] sm:$0xff]  ;;  %v910_v1 = vld [vmem:[%s1201_s4 + $0x70] sm:$0xff]  ;;  %vm57_vm0 = vcmask 261120   ;;  %v83_v43 = vlaneseq  ;;  %s708_s20 = sshll.u32 %s1205_s8, 4  ;;  %s709_s20 = int_to_ptr.hbm [resolvable:$true] %s708_s20 }
   0x7   :  { %104 = vmatpush.msra.mxu1 %v905_v0  ;;  %174 = vmatpush.msra.mxu2 %v905_v0  ;;  %v917_v2 = vld [vmem:[%s1201_s4 + $0x68] sm:$0xff]  ;;  %v52_v3 = vld [vmem:[%s1199_s2 + $0x18] sm:$0xff]  ;;  %v51_v4 = vld [vmem:[%s1199_s2 + $0x10] sm:$0xff] }
   0x8   :  { %244 = vmatpush.msra.mxu3 %v905_v0  ;;  %73 = vmatpush.msra.mxu0 %v52_v3  ;;  %v930_v5 = vld [vmem:[%s1201_s4 + $0x60] sm:$0xff]  ;;  %v50_v6 = vld [vmem:[%s1199_s2 + $0x8] sm:$0xff]  ;;  %v941_v7 = vld [vmem:[%s1201_s4 + $0x58] sm:$0xff]  ;;  %v1141_v44 = vand.u32 127, %v83_v43 }
   0x9   :  { %105 = vmatpush.msra.mxu1 %v910_v1  ;;  %175 = vmatpush.msra.mxu2 %v910_v1  ;;  %v49_v8 = vld [vmem:[%s1199_s2] sm:$0xff]  ;;  %v955_v10 = vld [vmem:[%s1201_s4 + $0x50] sm:$0xff]  ;;  %v963_v11 = vld [vmem:[%s1201_s4 + $0x48] sm:$0xff] }
   0xa   :  { %245 = vmatpush.msra.mxu3 %v910_v1  ;;  %74 = vmatpush.msra.mxu0 %v51_v4  ;;  %v48_v9 = vld [vmem:[%s1197_s0] sm:$0xff]  ;;  %v980_v13 = vld [vmem:[%s1201_s4 + $0x38] sm:$0xff]  ;;  %v989_v14 = vld [vmem:[%s1201_s4 + $0x30] sm:$0xff]  ;;  %vm85_vm5 = vcmp.ge.s32.totalorder %v1141_v44, 96 }
   0xb   :  { %106 = vmatpush.msra.mxu1 %v917_v2  ;;  %176 = vmatpush.msra.mxu2 %v917_v2  ;;  %v971_v12 = vld [vmem:[%s1201_s4 + $0x40] sm:$0xff]  ;;  %v998_v15 = vld [vmem:[%s1201_s4 + $0x28] sm:$0xff]  ;;  %v1016_v17 = vld [vmem:[%s1201_s4 + $0x18] sm:$0xff] }
   0xc   :  { %246 = vmatpush.msra.mxu3 %v917_v2  ;;  %75 = vmatpush.msra.mxu0 %v50_v6  ;;  %v1007_v16 = vld [vmem:[%s1201_s4 + $0x20] sm:$0xff]  ;;  %v1025_v18 = vld [vmem:[%s1201_s4 + $0x10] sm:$0xff]  ;;  %v1034_v19 = vld [vmem:[%s1201_s4 + $0x8] sm:$0xff] }
   0xd   :  { %107 = vmatpush.msra.mxu1 %v930_v5  ;;  %177 = vmatpush.msra.mxu2 %v930_v5  ;;  %v1043_v20 = vld [vmem:[%s1201_s4] sm:$0xff] }
   0xe   :  { %247 = vmatpush.msra.mxu3 %v930_v5  ;;  %76 = vmatpush.msra.mxu0 %v49_v8  ;;  %v1051_v21 = vld [vmem:[%s1198_s1] sm:$0x1] }
   0xf   :  { %108 = vmatpush.msra.mxu1 %v941_v7  ;;  %722 = vmatmul.msk.f32.vlgmr.msra.gmra.mxu0 %vm57_vm0, %v48_v9  ;;  %v737_v22 = vld [vmem:[%s1200_s3] ss:$0 sm:$0xff]  ;;  %s846_s3 = smov 64  }
  0x10   :  { %178 = vmatpush.msra.mxu2 %v941_v7  ;;  %248 = vmatpush.msra.mxu3 %v941_v7  ;;  %v1137_v25 = vld [vmem:[%s1202_s5] sm:$0x1]  ;;  %s847_s5 = smov 32  }
  0x11   :  { %109 = vmatpush.msra.mxu1 %v955_v10  ;;  %314 = vmatpush.msrb.mxu0 %v905_v0 }
  0x12   :  { %179 = vmatpush.msra.mxu2 %v955_v10  ;;  %249 = vmatpush.msra.mxu3 %v955_v10 }
  0x13   :  { %110 = vmatpush.msra.mxu1 %v963_v11  ;;  %315 = vmatpush.msrb.mxu0 %v910_v1 }
  0x14   :  { %180 = vmatpush.msra.mxu2 %v963_v11  ;;  %250 = vmatpush.msra.mxu3 %v963_v11 }
  0x15   :  { %111 = vmatpush.msra.mxu1 %v971_v12  ;;  %316 = vmatpush.msrb.mxu0 %v917_v2 }
  0x16   :  { %181 = vmatpush.msra.mxu2 %v971_v12  ;;  %251 = vmatpush.msra.mxu3 %v971_v12 }
  0x17   :  { %112 = vmatpush.msra.mxu1 %v980_v13  ;;  %317 = vmatpush.msrb.mxu0 %v930_v5 }
  0x18   :  { %182 = vmatpush.msra.mxu2 %v980_v13  ;;  %252 = vmatpush.msra.mxu3 %v980_v13 }
  0x19   :  { %113 = vmatpush.msra.mxu1 %v989_v14  ;;  %318 = vmatpush.msrb.mxu0 %v941_v7 }
  0x1a   :  { %183 = vmatpush.msra.mxu2 %v989_v14  ;;  %253 = vmatpush.msra.mxu3 %v989_v14 }
  0x1b   :  { %114 = vmatpush.msra.mxu1 %v998_v15  ;;  %319 = vmatpush.msrb.mxu0 %v955_v10 }
  0x1c   :  { %184 = vmatpush.msra.mxu2 %v998_v15  ;;  %254 = vmatpush.msra.mxu3 %v998_v15 }
  0x1d   :  { %115 = vmatpush.msra.mxu1 %v1007_v16  ;;  %320 = vmatpush.msrb.mxu0 %v963_v11 }
  0x1e   :  { %185 = vmatpush.msra.mxu2 %v1007_v16  ;;  %255 = vmatpush.msra.mxu3 %v1007_v16 }
  0x1f   :  { %116 = vmatpush.msra.mxu1 %v1016_v17  ;;  %321 = vmatpush.msrb.mxu0 %v971_v12 }
  0x20   :  { %186 = vmatpush.msra.mxu2 %v1016_v17  ;;  %256 = vmatpush.msra.mxu3 %v1016_v17 }
  0x21   :  { %117 = vmatpush.msra.mxu1 %v1025_v18  ;;  %322 = vmatpush.msrb.mxu0 %v980_v13 }
  0x22   :  { %187 = vmatpush.msra.mxu2 %v1025_v18  ;;  %257 = vmatpush.msra.mxu3 %v1025_v18 }
  0x23   :  { %118 = vmatpush.msra.mxu1 %v1034_v19  ;;  %323 = vmatpush.msrb.mxu0 %v989_v14 }
  0x24   :  { %188 = vmatpush.msra.mxu2 %v1034_v19  ;;  %258 = vmatpush.msra.mxu3 %v1034_v19 }
  0x25   :  { %119 = vmatpush.msra.mxu1 %v1043_v20  ;;  %324 = vmatpush.msrb.mxu0 %v998_v15 }
  0x26   :  { %120 = vmatmul.f32.vlgmr.msra.gmra.mxu1 %v1051_v21  ;;  %189 = vmatpush.msra.mxu2 %v1043_v20 }
  0x27   :  { %259 = vmatpush.msra.mxu3 %v1043_v20  ;;  %384 = vmatpush.msrb.mxu1 %v905_v0 }
  0x28   :  { %454 = vmatpush.msrb.mxu2 %v905_v0  ;;  %325 = vmatpush.msrb.mxu0 %v1007_v16 }
  0x29   :  { %524 = vmatpush.msrb.mxu3 %v905_v0  ;;  %385 = vmatpush.msrb.mxu1 %v910_v1 }
  0x2a   :  { %455 = vmatpush.msrb.mxu2 %v910_v1  ;;  %326 = vmatpush.msrb.mxu0 %v1016_v17 }
  0x2b   :  { %525 = vmatpush.msrb.mxu3 %v910_v1  ;;  %386 = vmatpush.msrb.mxu1 %v917_v2 }
  0x2c   :  { %456 = vmatpush.msrb.mxu2 %v917_v2  ;;  %327 = vmatpush.msrb.mxu0 %v1025_v18 }
  0x2d   :  { %526 = vmatpush.msrb.mxu3 %v917_v2  ;;  %387 = vmatpush.msrb.mxu1 %v930_v5 }
  0x2e   :  { %457 = vmatpush.msrb.mxu2 %v930_v5  ;;  %328 = vmatpush.msrb.mxu0 %v1034_v19 }
  0x2f   :  { %527 = vmatpush.msrb.mxu3 %v930_v5  ;;  %388 = vmatpush.msrb.mxu1 %v941_v7 }
  0x30   :  { %458 = vmatpush.msrb.mxu2 %v941_v7  ;;  %329 = vmatpush.msrb.mxu0 %v1043_v20 }
  0x31   :  { %528 = vmatpush.msrb.mxu3 %v941_v7  ;;  %389 = vmatpush.msrb.mxu1 %v955_v10 }
  0x32   :  { %459 = vmatpush.msrb.mxu2 %v955_v10  ;;  %594 = vmatpush.msra.mxu0 %v905_v0 }
  0x33   :  { %529 = vmatpush.msrb.mxu3 %v955_v10  ;;  %390 = vmatpush.msrb.mxu1 %v963_v11 }
  0x34   :  { %460 = vmatpush.msrb.mxu2 %v963_v11  ;;  %595 = vmatpush.msra.mxu0 %v910_v1 }
  0x35   :  { %530 = vmatpush.msrb.mxu3 %v963_v11  ;;  %391 = vmatpush.msrb.mxu1 %v971_v12 }
  0x36   :  { %461 = vmatpush.msrb.mxu2 %v971_v12  ;;  %596 = vmatpush.msra.mxu0 %v917_v2 }
  0x37   :  { %531 = vmatpush.msrb.mxu3 %v971_v12  ;;  %392 = vmatpush.msrb.mxu1 %v980_v13 }
  0x38   :  { %462 = vmatpush.msrb.mxu2 %v980_v13  ;;  %597 = vmatpush.msra.mxu0 %v930_v5 }
  0x39   :  { %532 = vmatpush.msrb.mxu3 %v980_v13  ;;  %393 = vmatpush.msrb.mxu1 %v989_v14 }
  0x3a   :  { %463 = vmatpush.msrb.mxu2 %v989_v14  ;;  %598 = vmatpush.msra.mxu0 %v941_v7 }
  0x3b   :  { %533 = vmatpush.msrb.mxu3 %v989_v14  ;;  %394 = vmatpush.msrb.mxu1 %v998_v15 }
  0x3c   :  { %464 = vmatpush.msrb.mxu2 %v998_v15  ;;  %599 = vmatpush.msra.mxu0 %v955_v10 }
  0x3d   :  { %534 = vmatpush.msrb.mxu3 %v998_v15  ;;  %395 = vmatpush.msrb.mxu1 %v1007_v16 }
  0x3e   :  { %465 = vmatpush.msrb.mxu2 %v1007_v16  ;;  %600 = vmatpush.msra.mxu0 %v963_v11 }
  0x3f   :  { %535 = vmatpush.msrb.mxu3 %v1007_v16  ;;  %396 = vmatpush.msrb.mxu1 %v1016_v17 }
  0x40   :  { %466 = vmatpush.msrb.mxu2 %v1016_v17  ;;  %601 = vmatpush.msra.mxu0 %v971_v12 }
  0x41   :  { %536 = vmatpush.msrb.mxu3 %v1016_v17  ;;  %397 = vmatpush.msrb.mxu1 %v1025_v18 }
  0x42   :  { %467 = vmatpush.msrb.mxu2 %v1025_v18  ;;  %602 = vmatpush.msra.mxu0 %v980_v13 }
  0x43   :  { %537 = vmatpush.msrb.mxu3 %v1025_v18  ;;  %398 = vmatpush.msrb.mxu1 %v1034_v19 }
  0x44   :  { %468 = vmatpush.msrb.mxu2 %v1034_v19  ;;  %603 = vmatpush.msra.mxu0 %v989_v14 }
  0x45   :  { %538 = vmatpush.msrb.mxu3 %v1034_v19  ;;  %399 = vmatpush.msrb.mxu1 %v1043_v20 }
  0x46   :  { %469 = vmatpush.msrb.mxu2 %v1043_v20  ;;  %604 = vmatpush.msra.mxu0 %v998_v15 }
  0x47   :  { %539 = vmatpush.msrb.mxu3 %v1043_v20 }
  0x48   :  { %605 = vmatpush.msra.mxu0 %v1007_v16 }
  0x4a   :  { %606 = vmatpush.msra.mxu0 %v1016_v17 }
  0x4c   :  { %607 = vmatpush.msra.mxu0 %v1025_v18 }
  0x4e   :  { %608 = vmatpush.msra.mxu0 %v1034_v19 }
  0x50   :  { %609 = vmatpush.msra.mxu0 %v1043_v20 }
  0x8c   :  { %v78_v23 = vpop.f32.mrf.mxu0 }
  0x8d   :  { %v79_v24 = vadd.f32 %v737_v22, %v78_v23 }
  0x8f   :  { %81 = vst [vmem:[#allocation2] sm:$0xff] %v79_v24 }
  0x96   :  { %v87_v26 = vld [vmem:[#allocation2] sm:$0x1]  ;;  %v157_v57 = vld [vmem:[#allocation2 + $0x1] sm:$0x1]  ;;  %v227_v20 = vld [vmem:[#allocation2 + $0x2] sm:$0x1] }
  0xa3   :  { %v121_v27 = vpop.f32.mrf.mxu1 }
  0xa4   :  { %v122_v28 = vadd.f32 %v121_v27, %v1137_v25 }
  0xa6   :  { %v124_v29 = vadd.f32 %v122_v28, %v87_v26 }
  0xa8   :  { %v723_v30 = vmul.f32 -1.442695, %v124_v29 }
  0xaa   :  { %739 = vpow2.f32 %v723_v30 }
  0xb0   :  { %v740_v31 = vpop.eup %739 }
  0xb1   :  { %v128_v32 = vadd.f32 1.0, %v740_v31 }
  0xb3   :  { %741 = vrcp.f32 %v128_v32  ;;  %v140_v36 = vand.u32 2147483648, %v128_v32  ;;  %v138_v38 = vand.u32 2147483647, %v128_v32  ;;  %vm134_vm2 = vweird.f32 %v128_v32 }
  0xb5   :  { %v141_v40 = vor.u32 1.1754944e-38, %v140_v36  ;;  %vm139_vm4 = vcmp.eq.f32.partialorder %v138_v38, 8.507059e+37 }
  0xb9   :  { %v742_v33 = vpop.eup %741 }
  0xba   :  { %v130_v34 = vmul.f32 %v742_v33, %v128_v32  ;;  %vm135_vm1 = vweird.f32 %v742_v33 }
  0xbb   :  { %vm136_vm3 = vmor %vm134_vm2, %vm135_vm1 }
  0xbc   :  { %v131_v35 = vsub.f32 1.0, %v130_v34 }
  0xbe   :  { %v132_v37 = vmul.f32 %v742_v33, %v131_v35 }
  0xc0   :  { %v133_v39 = vadd.f32 %v742_v33, %v132_v37 }
  0xc2   :  { %v137_v41 = vsel %vm136_vm3, %v742_v33, %v133_v39 }
  0xc3   :  { %v142_v42 = vsel %vm139_vm4, %v141_v40, %v137_v41 }
  0xc4   :  { %144 = vrot.lane.b32.xlu0 %v142_v42, %s846_s3 }
 0x136   :  { %v145_v45 = vpop.permute.xlu0 %144 }
 0x137   :  { %v149_v46 = vsel %vm85_vm5, %v145_v45, %v142_v42  ;;  %v146_v47 = vmul.f32 %v145_v45, %v122_v28 }
 0x138   :  { %150 = vrot.lane.b32.xlu0 %v149_v46, %s847_s5 }
 0x139   :  { %v147_v48 = vadd.f32 %v146_v47, %v87_v26 }
 0x13b   :  { %743 = vtanh.f32 %v147_v48 }
 0x141   :  { %v744_v51 = vpop.eup %743 }
 0x1aa   :  { %v151_v49 = vpop.permute.xlu0 %150 }
 0x1ab   :  { %v152_v50 = vsub.f32 1.0, %v151_v49  ;;  %v154_v53 = vmul.f32 %v151_v49, %v1051_v21  ;;  %v297_v49 = vld [vmem:[#allocation2 + $0x3] sm:$0x1] }
 0x1ad   :  { %v153_v52 = vmul.f32 %v744_v51, %v152_v50 }
 0x1af   :  { %v155_v54 = vadd.f32 %v154_v53, %v153_v52 }
 0x1b1   :  { %156 = vst [vmem:[#allocation3] sm:$0x1] %v155_v54  ;;  %190 = vmatmul.f32.vlgmr.msra.gmra.mxu2 %v155_v54 }
 0x234   :  { %v191_v55 = vpop.f32.mrf.mxu2 }
 0x235   :  { %v192_v56 = vadd.f32 %v191_v55, %v1137_v25 }
 0x237   :  { %v194_v58 = vadd.f32 %v192_v56, %v157_v57 }
 0x239   :  { %v724_v59 = vmul.f32 -1.442695, %v194_v58 }
 0x23b   :  { %745 = vpow2.f32 %v724_v59 }
 0x241   :  { %v746_v60 = vpop.eup %745 }
 0x242   :  { %v198_v61 = vadd.f32 1.0, %v746_v60 }
 0x244   :  { %747 = vrcp.f32 %v198_v61  ;;  %v210_v1 = vand.u32 2147483648, %v198_v61  ;;  %v208_v3 = vand.u32 2147483647, %v198_v61  ;;  %vm204_vm7 = vweird.f32 %v198_v61 }
 0x246   :  { %v211_v5 = vor.u32 1.1754944e-38, %v210_v1  ;;  %vm209_vm9 = vcmp.eq.f32.partialorder %v208_v3, 8.507059e+37 }
 0x24a   :  { %v748_v62 = vpop.eup %747 }
 0x24b   :  { %v200_v63 = vmul.f32 %v748_v62, %v198_v61  ;;  %vm205_vm6 = vweird.f32 %v748_v62 }
 0x24c   :  { %vm206_vm8 = vmor %vm204_vm7, %vm205_vm6 }
 0x24d   :  { %v201_v0 = vsub.f32 1.0, %v200_v63 }
 0x24f   :  { %v202_v2 = vmul.f32 %v748_v62, %v201_v0 }
 0x251   :  { %v203_v4 = vadd.f32 %v748_v62, %v202_v2 }
 0x253   :  { %v207_v6 = vsel %vm206_vm8, %v748_v62, %v203_v4 }
 0x254   :  { %v212_v7 = vsel %vm209_vm9, %v211_v5, %v207_v6 }
 0x255   :  { %214 = vrot.lane.b32.xlu1 %v212_v7, %s846_s3 }
 0x2c7   :  { %v215_v8 = vpop.permute.xlu1 %214 }
 0x2c8   :  { %v219_v9 = vsel %vm85_vm5, %v215_v8, %v212_v7  ;;  %v216_v10 = vmul.f32 %v215_v8, %v192_v56 }
 0x2c9   :  { %220 = vrot.lane.b32.xlu1 %v219_v9, %s847_s5 }
 0x2ca   :  { %v217_v11 = vadd.f32 %v216_v10, %v157_v57 }
 0x2cc   :  { %749 = vtanh.f32 %v217_v11 }
 0x2d2   :  { %v750_v14 = vpop.eup %749 }
 0x33b   :  { %v221_v12 = vpop.permute.xlu1 %220 }
 0x33c   :  { %v222_v13 = vsub.f32 1.0, %v221_v12  ;;  %v224_v16 = vmul.f32 %v221_v12, %v155_v54  ;;  %v367_v12 = vld [vmem:[#allocation2 + $0x4] sm:$0x1] }
 0x33e   :  { %v223_v15 = vmul.f32 %v750_v14, %v222_v13 }
 0x340   :  { %v225_v17 = vadd.f32 %v224_v16, %v223_v15 }
 0x342   :  { %226 = vst [vmem:[#allocation3 + $0x1] sm:$0x1] %v225_v17  ;;  %260 = vmatmul.f32.vlgmr.msra.gmra.mxu3 %v225_v17 }
 0x3c5   :  { %v261_v18 = vpop.f32.mrf.mxu3 }
 0x3c6   :  { %v262_v19 = vadd.f32 %v261_v18, %v1137_v25 }
 0x3c8   :  { %v264_v21 = vadd.f32 %v262_v19, %v227_v20 }
 0x3ca   :  { %v725_v22 = vmul.f32 -1.442695, %v264_v21 }
 0x3cc   :  { %751 = vpow2.f32 %v725_v22 }
 0x3d2   :  { %v752_v23 = vpop.eup %751 }
 0x3d3   :  { %v268_v24 = vadd.f32 1.0, %v752_v23 }
 0x3d5   :  { %753 = vrcp.f32 %v268_v24  ;;  %v280_v29 = vand.u32 2147483648, %v268_v24  ;;  %v278_v31 = vand.u32 2147483647, %v268_v24  ;;  %vm274_vm11 = vweird.f32 %v268_v24 }
 0x3d7   :  { %v281_v33 = vor.u32 1.1754944e-38, %v280_v29  ;;  %vm279_vm13 = vcmp.eq.f32.partialorder %v278_v31, 8.507059e+37 }
 0x3db   :  { %v754_v26 = vpop.eup %753 }
 0x3dc   :  { %v270_v27 = vmul.f32 %v754_v26, %v268_v24  ;;  %vm275_vm10 = vweird.f32 %v754_v26 }
 0x3dd   :  { %vm276_vm12 = vmor %vm274_vm11, %vm275_vm10 }
 0x3de   :  { %v271_v28 = vsub.f32 1.0, %v270_v27 }
 0x3e0   :  { %v272_v30 = vmul.f32 %v754_v26, %v271_v28 }
 0x3e2   :  { %v273_v32 = vadd.f32 %v754_v26, %v272_v30 }
 0x3e4   :  { %v277_v34 = vsel %vm276_vm12, %v754_v26, %v273_v32 }
 0x3e5   :  { %v282_v35 = vsel %vm279_vm13, %v281_v33, %v277_v34 }
 0x3e6   :  { %284 = vrot.lane.b32.xlu2 %v282_v35, %s846_s3 }
 0x440   :  { %v285_v36 = vpop.permute.xlu2 %284 }
 0x441   :  { %v289_v37 = vsel %vm85_vm5, %v285_v36, %v282_v35  ;;  %v286_v38 = vmul.f32 %v285_v36, %v262_v19 }
 0x442   :  { %290 = vrot.lane.b32.xlu2 %v289_v37, %s847_s5 }
 0x443   :  { %v287_v39 = vadd.f32 %v286_v38, %v227_v20 }
 0x445   :  { %755 = vtanh.f32 %v287_v39 }
 0x44b   :  { %v756_v42 = vpop.eup %755 }
 0x49c   :  { %v291_v40 = vpop.permute.xlu2 %290 }
 0x49d   :  { %v292_v41 = vsub.f32 1.0, %v291_v40  ;;  %v294_v45 = vmul.f32 %v291_v40, %v225_v17  ;;  %v437_v40 = vld [vmem:[#allocation2 + $0x5] sm:$0x1] }
 0x49f   :  { %v293_v43 = vmul.f32 %v756_v42, %v292_v41 }
 0x4a1   :  { %v295_v46 = vadd.f32 %v294_v45, %v293_v43 }
 0x4a3   :  { %296 = vst [vmem:[#allocation3 + $0x2] sm:$0x1] %v295_v46  ;;  %330 = vmatmul.f32.vlgmr.msrb.gmra.mxu0 %v295_v46 }
 0x520   :  { %v331_v47 = vpop.f32.mrf.mxu0 }
 0x521   :  { %v332_v48 = vadd.f32 %v331_v47, %v1137_v25 }
 0x523   :  { %v334_v50 = vadd.f32 %v332_v48, %v297_v49 }
 0x525   :  { %v726_v51 = vmul.f32 -1.442695, %v334_v50 }
 0x527   :  { %757 = vpow2.f32 %v726_v51 }
 0x52d   :  { %v758_v52 = vpop.eup %757 }
 0x52e   :  { %v338_v53 = vadd.f32 1.0, %v758_v52 }
 0x530   :  { %759 = vrcp.f32 %v338_v53  ;;  %v350_v57 = vand.u32 2147483648, %v338_v53  ;;  %v348_v59 = vand.u32 2147483647, %v338_v53  ;;  %vm344_vm15 = vweird.f32 %v338_v53 }
 0x532   :  { %v351_v61 = vor.u32 1.1754944e-38, %v350_v57  ;;  %vm349_vm1 = vcmp.eq.f32.partialorder %v348_v59, 8.507059e+37 }
 0x536   :  { %v760_v54 = vpop.eup %759 }
 0x537   :  { %v340_v55 = vmul.f32 %v760_v54, %v338_v53  ;;  %vm345_vm14 = vweird.f32 %v760_v54 }
 0x538   :  { %vm346_vm0 = vmor %vm344_vm15, %vm345_vm14 }
 0x539   :  { %v341_v56 = vsub.f32 1.0, %v340_v55 }
 0x53b   :  { %v342_v58 = vmul.f32 %v760_v54, %v341_v56 }
 0x53d   :  { %v343_v60 = vadd.f32 %v760_v54, %v342_v58 }
 0x53f   :  { %v347_v62 = vsel %vm346_vm0, %v760_v54, %v343_v60 }
 0x540   :  { %v352_v63 = vsel %vm349_vm1, %v351_v61, %v347_v62 }
 0x541   :  { %354 = vrot.lane.b32.xlu0 %v352_v63, %s846_s3 }
 0x5b3   :  { %v355_v0 = vpop.permute.xlu0 %354 }
 0x5b4   :  { %v359_v1 = vsel %vm85_vm5, %v355_v0, %v352_v63  ;;  %v356_v2 = vmul.f32 %v355_v0, %v332_v48 }
 0x5b5   :  { %360 = vrot.lane.b32.xlu1 %v359_v1, %s847_s5 }
 0x5b6   :  { %v357_v3 = vadd.f32 %v356_v2, %v297_v49 }
 0x5b8   :  { %761 = vtanh.f32 %v357_v3 }
 0x5be   :  { %v762_v6 = vpop.eup %761 }
 0x627   :  { %v361_v4 = vpop.permute.xlu1 %360 }
 0x628   :  { %v362_v5 = vsub.f32 1.0, %v361_v4  ;;  %v364_v8 = vmul.f32 %v361_v4, %v295_v46  ;;  %v507_v4 = vld [vmem:[#allocation2 + $0x6] sm:$0x1] }
 0x62a   :  { %v363_v7 = vmul.f32 %v762_v6, %v362_v5 }
 0x62c   :  { %v365_v9 = vadd.f32 %v364_v8, %v363_v7 }
 0x62e   :  { %366 = vst [vmem:[#allocation3 + $0x3] sm:$0x1] %v365_v9  ;;  %400 = vmatmul.f32.vlgmr.msrb.gmra.mxu1 %v365_v9 }
 0x6ab   :  { %v401_v10 = vpop.f32.mrf.mxu1 }
 0x6ac   :  { %v402_v11 = vadd.f32 %v401_v10, %v1137_v25 }
 0x6ae   :  { %v404_v13 = vadd.f32 %v402_v11, %v367_v12 }
 0x6b0   :  { %v727_v14 = vmul.f32 -1.442695, %v404_v13 }
 0x6b2   :  { %763 = vpow2.f32 %v727_v14 }
 0x6b8   :  { %v764_v15 = vpop.eup %763 }
 0x6b9   :  { %v408_v16 = vadd.f32 1.0, %v764_v15 }
 0x6bb   :  { %765 = vrcp.f32 %v408_v16  ;;  %v420_v20 = vand.u32 2147483648, %v408_v16  ;;  %v418_v22 = vand.u32 2147483647, %v408_v16  ;;  %vm414_vm3 = vweird.f32 %v408_v16 }
 0x6bd   :  { %v421_v24 = vor.u32 1.1754944e-38, %v420_v20  ;;  %vm419_vm6 = vcmp.eq.f32.partialorder %v418_v22, 8.507059e+37 }
 0x6c1   :  { %v766_v17 = vpop.eup %765 }
 0x6c2   :  { %v410_v18 = vmul.f32 %v766_v17, %v408_v16  ;;  %vm415_vm2 = vweird.f32 %v766_v17 }
 0x6c3   :  { %vm416_vm4 = vmor %vm414_vm3, %vm415_vm2 }
 0x6c4   :  { %v411_v19 = vsub.f32 1.0, %v410_v18 }
 0x6c6   :  { %v412_v21 = vmul.f32 %v766_v17, %v411_v19 }
 0x6c8   :  { %v413_v23 = vadd.f32 %v766_v17, %v412_v21 }
 0x6ca   :  { %v417_v26 = vsel %vm416_vm4, %v766_v17, %v413_v23 }
 0x6cb   :  { %v422_v27 = vsel %vm419_vm6, %v421_v24, %v417_v26 }
 0x6cc   :  { %424 = vrot.lane.b32.xlu2 %v422_v27, %s846_s3 }
 0x726   :  { %v425_v28 = vpop.permute.xlu2 %424 }
 0x727   :  { %v429_v29 = vsel %vm85_vm5, %v425_v28, %v422_v27  ;;  %v426_v30 = vmul.f32 %v425_v28, %v402_v11 }
 0x728   :  { %430 = vrot.lane.b32.xlu0 %v429_v29, %s847_s5 }
 0x729   :  { %v427_v31 = vadd.f32 %v426_v30, %v367_v12 }
 0x72b   :  { %767 = vtanh.f32 %v427_v31 }
 0x731   :  { %v768_v34 = vpop.eup %767 }
 0x79a   :  { %v431_v32 = vpop.permute.xlu0 %430 }
 0x79b   :  { %v432_v33 = vsub.f32 1.0, %v431_v32  ;;  %v434_v36 = vmul.f32 %v431_v32, %v365_v9  ;;  %v577_v32 = vld [vmem:[#allocation2 + $0x7] sm:$0x1] }
 0x79d   :  { %v433_v35 = vmul.f32 %v768_v34, %v432_v33 }
 0x79f   :  { %v435_v37 = vadd.f32 %v434_v36, %v433_v35 }
 0x7a1   :  { %436 = vst [vmem:[#allocation3 + $0x4] sm:$0x1] %v435_v37  ;;  %470 = vmatmul.f32.vlgmr.msrb.gmra.mxu2 %v435_v37 }
 0x824   :  { %v471_v38 = vpop.f32.mrf.mxu2 }
 0x825   :  { %v472_v39 = vadd.f32 %v471_v38, %v1137_v25 }
 0x827   :  { %v474_v41 = vadd.f32 %v472_v39, %v437_v40 }
 0x829   :  { %v728_v42 = vmul.f32 -1.442695, %v474_v41 }
 0x82b   :  { %769 = vpow2.f32 %v728_v42 }
 0x831   :  { %v770_v43 = vpop.eup %769 }
 0x832   :  { %v478_v45 = vadd.f32 1.0, %v770_v43 }
 0x834   :  { %771 = vrcp.f32 %v478_v45  ;;  %v490_v49 = vand.u32 2147483648, %v478_v45  ;;  %v488_v51 = vand.u32 2147483647, %v478_v45  ;;  %vm484_vm8 = vweird.f32 %v478_v45 }
 0x836   :  { %v491_v53 = vor.u32 1.1754944e-38, %v490_v49  ;;  %vm489_vm10 = vcmp.eq.f32.partialorder %v488_v51, 8.507059e+37  ;;  %v662_v49 = vld [vmem:[#allocation4 + $0x68] sm:$0xff]  ;;  %v660_v51 = vld [vmem:[#allocation4 + $0x58] sm:$0xff] }
 0x83a   :  { %v772_v46 = vpop.eup %771 }
 0x83b   :  { %v480_v47 = vmul.f32 %v772_v46, %v478_v45  ;;  %vm485_vm7 = vweird.f32 %v772_v46 }
 0x83c   :  { %vm486_vm9 = vmor %vm484_vm8, %vm485_vm7 }
 0x83d   :  { %v481_v48 = vsub.f32 1.0, %v480_v47  ;;  %v664_v47 = vld [vmem:[#allocation4 + $0x78] sm:$0xff] }
 0x83e   :  { %669 = vmatpush.msra.mxu1 %v664_v47 }
 0x83f   :  { %v482_v50 = vmul.f32 %v772_v46, %v481_v48  ;;  %v663_v48 = vld [vmem:[#allocation4 + $0x70] sm:$0xff] }
 0x840   :  { %670 = vmatpush.msra.mxu1 %v663_v48 }
 0x841   :  { %v483_v52 = vadd.f32 %v772_v46, %v482_v50  ;;  %v661_v50 = vld [vmem:[#allocation4 + $0x60] sm:$0xff] }
 0x842   :  { %671 = vmatpush.msra.mxu1 %v662_v49 }
 0x843   :  { %v487_v54 = vsel %vm486_vm9, %v772_v46, %v483_v52  ;;  %v659_v52 = vld [vmem:[#allocation4 + $0x50] sm:$0xff] }
 0x844   :  { %v492_v55 = vsel %vm489_vm10, %v491_v53, %v487_v54  ;;  %672 = vmatpush.msra.mxu1 %v661_v50  ;;  %v658_v53 = vld [vmem:[#allocation4 + $0x48] sm:$0xff]  ;;  %v657_v54 = vld [vmem:[#allocation4 + $0x40] sm:$0xff] }
 0x845   :  { %494 = vrot.lane.b32.xlu1 %v492_v55, %s846_s3 }
 0x846   :  { %673 = vmatpush.msra.mxu1 %v660_v51 }
 0x848   :  { %674 = vmatpush.msra.mxu1 %v659_v52 }
 0x84a   :  { %675 = vmatpush.msra.mxu1 %v658_v53 }
 0x84c   :  { %676 = vmatpush.msra.mxu1 %v657_v54 }
 0x8b7   :  { %v495_v56 = vpop.permute.xlu1 %494 }
 0x8b8   :  { %v499_v57 = vsel %vm85_vm5, %v495_v56, %v492_v55  ;;  %v496_v58 = vmul.f32 %v495_v56, %v472_v39  ;;  %v656_v55 = vld [vmem:[#allocation4 + $0x38] sm:$0xff] }
 0x8b9   :  { %500 = vrot.lane.b32.xlu2 %v499_v57, %s847_s5  ;;  %677 = vmatpush.msra.mxu1 %v656_v55 }
 0x8ba   :  { %v497_v59 = vadd.f32 %v496_v58, %v437_v40  ;;  %v655_v58 = vld [vmem:[#allocation4 + $0x30] sm:$0xff] }
 0x8bb   :  { %678 = vmatpush.msra.mxu1 %v655_v58 }
 0x8bc   :  { %773 = vtanh.f32 %v497_v59  ;;  %v654_v59 = vld [vmem:[#allocation4 + $0x28] sm:$0xff] }
 0x8bd   :  { %679 = vmatpush.msra.mxu1 %v654_v59 }
 0x8c2   :  { %v774_v62 = vpop.eup %773 }
 0x913   :  { %v501_v60 = vpop.permute.xlu2 %500 }
 0x914   :  { %v502_v61 = vsub.f32 1.0, %v501_v60  ;;  %v504_v0 = vmul.f32 %v501_v60, %v435_v37  ;;  %v653_v60 = vld [vmem:[#allocation4 + $0x20] sm:$0xff] }
 0x915   :  { %680 = vmatpush.msra.mxu1 %v653_v60 }
 0x916   :  { %v503_v63 = vmul.f32 %v774_v62, %v502_v61  ;;  %v652_v61 = vld [vmem:[#allocation4 + $0x18] sm:$0xff]  ;;  %v651_v62 = vld [vmem:[#allocation4 + $0x10] sm:$0xff] }
 0x917   :  { %681 = vmatpush.msra.mxu1 %v652_v61 }
 0x918   :  { %v505_v1 = vadd.f32 %v504_v0, %v503_v63  ;;  %v650_v63 = vld [vmem:[#allocation4 + $0x8] sm:$0xff]  ;;  %v649_v0 = vld [vmem:[#allocation4] sm:$0xff] }
 0x919   :  { %682 = vmatpush.msra.mxu1 %v651_v62 }
 0x91a   :  { %506 = vst [vmem:[#allocation3 + $0x5] sm:$0x1] %v505_v1  ;;  %540 = vmatmul.f32.vlgmr.msrb.gmra.mxu3 %v505_v1 }
 0x91b   :  { %683 = vmatpush.msra.mxu1 %v650_v63 }
 0x91d   :  { %684 = vmatpush.msra.mxu1 %v649_v0 }
 0x99d   :  { %v541_v2 = vpop.f32.mrf.mxu3 }
 0x99e   :  { %v542_v3 = vadd.f32 %v541_v2, %v1137_v25 }
 0x9a0   :  { %v544_v5 = vadd.f32 %v542_v3, %v507_v4 }
 0x9a2   :  { %v729_v6 = vmul.f32 -1.442695, %v544_v5 }
 0x9a4   :  { %775 = vpow2.f32 %v729_v6 }
 0x9aa   :  { %v776_v7 = vpop.eup %775 }
 0x9ab   :  { %v548_v8 = vadd.f32 1.0, %v776_v7 }
 0x9ad   :  { %777 = vrcp.f32 %v548_v8  ;;  %v560_v12 = vand.u32 2147483648, %v548_v8  ;;  %v558_v14 = vand.u32 2147483647, %v548_v8  ;;  %vm554_vm12 = vweird.f32 %v548_v8 }
 0x9af   :  { %v561_v16 = vor.u32 1.1754944e-38, %v560_v12  ;;  %vm559_vm14 = vcmp.eq.f32.partialorder %v558_v14, 8.507059e+37 }
 0x9b3   :  { %v778_v9 = vpop.eup %777 }
 0x9b4   :  { %v550_v10 = vmul.f32 %v778_v9, %v548_v8  ;;  %vm555_vm11 = vweird.f32 %v778_v9 }
 0x9b5   :  { %vm556_vm13 = vmor %vm554_vm12, %vm555_vm11 }
 0x9b6   :  { %v551_v11 = vsub.f32 1.0, %v550_v10 }
 0x9b8   :  { %v552_v13 = vmul.f32 %v778_v9, %v551_v11 }
 0x9ba   :  { %v553_v15 = vadd.f32 %v778_v9, %v552_v13 }
 0x9bc   :  { %v557_v17 = vsel %vm556_vm13, %v778_v9, %v553_v15  ;;  %v738_v9 = vld [vmem:[%s1204_s7] ss:$0 sm:$0xff] }
 0x9bd   :  { %v562_v18 = vsel %vm559_vm14, %v561_v16, %v557_v17 }
 0x9be   :  { %564 = vrot.lane.b32.xlu0 %v562_v18, %s846_s3 }
 0xa30   :  { %v565_v19 = vpop.permute.xlu0 %564 }
 0xa31   :  { %v569_v20 = vsel %vm85_vm5, %v565_v19, %v562_v18  ;;  %v566_v21 = vmul.f32 %v565_v19, %v542_v3 }
 0xa32   :  { %570 = vrot.lane.b32.xlu1 %v569_v20, %s847_s5 }
 0xa33   :  { %v567_v22 = vadd.f32 %v566_v21, %v507_v4 }
 0xa35   :  { %779 = vtanh.f32 %v567_v22 }
 0xa3b   :  { %v780_v26 = vpop.eup %779 }
 0xaa4   :  { %v571_v23 = vpop.permute.xlu1 %570 }
 0xaa5   :  { %v572_v24 = vsub.f32 1.0, %v571_v23  ;;  %v574_v28 = vmul.f32 %v571_v23, %v505_v1 }
 0xaa7   :  { %v573_v27 = vmul.f32 %v780_v26, %v572_v24 }
 0xaa9   :  { %v1178_v29 = vadd.f32 %v574_v28, %v573_v27 }
 0xaab   :  { %576 = vst [vmem:[#allocation3 + $0x6] sm:$0x1] %v1178_v29  ;;  %610 = vmatmul.f32.vlgmr.msra.gmra.mxu0 %v1178_v29 }
 0xb28   :  { %v611_v30 = vpop.f32.mrf.mxu0 }
 0xb29   :  { %v612_v31 = vadd.f32 %v611_v30, %v1137_v25 }
 0xb2b   :  { %v614_v33 = vadd.f32 %v612_v31, %v577_v32 }
 0xb2d   :  { %v730_v34 = vmul.f32 -1.442695, %v614_v33 }
 0xb2f   :  { %781 = vpow2.f32 %v730_v34 }
 0xb35   :  { %v782_v35 = vpop.eup %781 }
 0xb36   :  { %v618_v36 = vadd.f32 1.0, %v782_v35 }
 0xb38   :  { %783 = vrcp.f32 %v618_v36  ;;  %v630_v40 = vand.u32 2147483648, %v618_v36  ;;  %v628_v42 = vand.u32 2147483647, %v618_v36  ;;  %vm624_vm0 = vweird.f32 %v618_v36 }
 0xb3a   :  { %v631_v45 = vor.u32 1.1754944e-38, %v630_v40  ;;  %vm629_vm2 = vcmp.eq.f32.partialorder %v628_v42, 8.507059e+37 }
 0xb3e   :  { %v784_v37 = vpop.eup %783 }
 0xb3f   :  { %v620_v38 = vmul.f32 %v784_v37, %v618_v36  ;;  %vm625_vm15 = vweird.f32 %v784_v37 }
 0xb40   :  { %vm626_vm1 = vmor %vm624_vm0, %vm625_vm15 }
 0xb41   :  { %v621_v39 = vsub.f32 1.0, %v620_v38 }
 0xb43   :  { %v622_v41 = vmul.f32 %v784_v37, %v621_v39 }
 0xb45   :  { %v623_v43 = vadd.f32 %v784_v37, %v622_v41 }
 0xb47   :  { %v627_v46 = vsel %vm626_vm1, %v784_v37, %v623_v43 }
 0xb48   :  { %v632_v25 = vsel %vm629_vm2, %v631_v45, %v627_v46 }
 0xb49   :  { %634 = vrot.lane.b32.xlu2 %v632_v25, %s846_s3 }
 0xba3   :  { %v635_v56 = vpop.permute.xlu2 %634 }
 0xba4   :  { %v639_v57 = vsel %vm85_vm5, %v635_v56, %v632_v25  ;;  %v636_v1 = vmul.f32 %v635_v56, %v612_v31 }
 0xba5   :  { %640 = vrot.lane.b32.xlu0 %v639_v57, %s847_s5 }
 0xba6   :  { %v637_v2 = vadd.f32 %v636_v1, %v577_v32 }
 0xba8   :  { %785 = vtanh.f32 %v637_v2 }
 0xbae   :  { %v786_v4 = vpop.eup %785 }
 0xc17   :  { %v641_v44 = vpop.permute.xlu0 %640 }
 0xc18   :  { %v642_v3 = vsub.f32 1.0, %v641_v44  ;;  %v644_v6 = vmul.f32 %v641_v44, %v1178_v29 }
 0xc1a   :  { %v643_v5 = vmul.f32 %v786_v4, %v642_v3 }
 0xc1c   :  { %v645_v7 = vadd.f32 %v644_v6, %v643_v5 }
 0xc1e   :  { %646 = vst [vmem:[#allocation3 + $0x7] sm:$0x1] %v645_v7 }
 0xc1f   :  { %647 = vst [vmem:[%s1206_s9] sm:$0x1] %v645_v7  ;;  %s848_s9 = smov [#allocation7]  }
 0xc20   :  { %s706_s18 = sshll.u32 %s848_s9, 4  ;;  %s707_s18 = int_to_ptr.vmem [resolvable:$true] %s706_s18 }
 0xc25   :  { %v648_v8 = vld [vmem:[#allocation3] sm:$0xff] }
 0xc26   :  { %685 = vmatmul.f32.vlgmr.msra.gmra.mxu1 %v648_v8 }
 0xca3   :  { %v686_v10 = vpop.f32.mrf.mxu1 }
 0xca4   :  { %v687_v11 = vadd.f32 %v738_v9, %v686_v10 }
 0xca6   :  { %689 = vmax.xlane.f32.xlu1 %v687_v11 }
 0xd19   :  { %v690_v12 = vpop.xlane.xlu1 %689 }
 0xd1a   :  { %v691_v13 = vsub.f32 %v687_v11, %v690_v12 }
 0xd1c   :  { %v692_v14 = vmul.f32 1.442695, %v691_v13 }
 0xd1e   :  { %787 = vpow2.f32 %v692_v14 }
 0xd24   :  { %v788_v15 = vpop.eup %787 }
 0xd25   :  { %694 = vadd.xlane.f32.xlu2 %v788_v15 }
 0xd98   :  { %v695_v16 = vpop.xlane.xlu2 %694 }
 0xd99   :  { %789 = vlog2.f32 %v695_v16 }
 0xd9f   :  { %v790_v17 = vpop.eup %789 }
 0xda0   :  { %v697_v18 = vmul.f32 0.6931472, %v790_v17 }
 0xda2   :  { %v698_v19 = vadd.f32 %v697_v18, %v690_v12 }
 0xda4   :  { %v699_v20 = vsub.f32 %v687_v11, %v698_v19 }
 0xda6   :  { %700 = vst [vmem:[#allocation7] sm:$0xff] %v699_v20 }
 0xda7   :  { %711 = dma.vmem_to_hbm [thread:$0]  %s707_s18, 128, %s709_s20, [#allocation6]  }
 0xda8   :  { %841 = dma.done.wait [#allocation6], 128  }
 0xda9   :  { %842 = vsyncadd [#allocation6], 4294967168 }
 0xdaa   :  { %720 = vsyncpa [#allocation5], 1 }
 0xdab   :  { %721 = vsyncpa [#allocation6], 1 }

</bundles_post_ra>
